<compile_context>
chip_gen: v5e
topology: v5e:2x2
jax: 0.10.0
libtpu: 0.0.40
codegen_flags: <defaults>
</compile_context>

<pallas_src>
import functools

import jax
import jax.numpy as jnp
import numpy as np
from jax.experimental import pallas as pl
from jax.experimental.pallas import tpu as pltpu


# ------------------------- helpers -------------------------

def _round_up(x, m):
    return (x + m - 1) // m * m


def _rowdot(w_rows, x):
    """(R, K) . (TB, K)^T -> (R, TB): per-row scalars land lane-dense along the batch dim."""
    return jax.lax.dot_general(
        w_rows, x,
        dimension_numbers=(((1,), (1,)), ((), ())),
        preferred_element_type=jnp.float32)


# ------------------------- Pallas kernel -------------------------

def deepwide_kernel(x1_ref, x2_ref, fused_ref, w1n_ref, w2_ref, w3c_ref, bias_ref,
                    out_ref, *, cat_dims):
    tb, num_fields = x1_ref.shape
    fcp = fused_ref.shape[0]                     # padded F*cat_dims (lane-dense 128)
    h1p = w1n_ref.shape[1]                       # layer-1 width (incl. FX column + pad)
    h2p = w2_ref.shape[1]                        # layer-2 width (incl. zfx + const-1 cols + pad)
    emb_e = (fused_ref.shape[1] - h1p) // 2      # embedding dim E

    x1 = x1_ref[...]                             # (TB, F) int32
    x2 = x2_ref[...].astype(jnp.bfloat16)        # (TB, NUM)

    # ---- one-hot over disjoint per-field row blocks: OR of boolean masks, one convert ----
    lane = jax.lax.broadcasted_iota(jnp.int32, (tb, fcp), 1)
    m = lane == x1[:, 0:1]                       # field 0 occupies rows [0, cat_dims)
    for f in range(1, num_fields):               # static unroll, F is tiny
        m = m | (lane == (x1[:, f:f + 1] + f * cat_dims))
    onehot = jnp.where(m, 1.0, 0.0).astype(jnp.bfloat16)         # (TB, FCP), exact 0/1

    # ---- single fused MXU matmul: [emb_flat @ W1ext | sum_f emb | sum_f emb^2] ----
    big = jnp.dot(onehot, fused_ref[...],
                  preferred_element_type=jnp.float32)            # (TB, H1P + 2E)
    h1_emb = big[:, :h1p]
    s = big[:, h1p:h1p + emb_e]                                  # sum_f emb      (TB, E)
    ssq = big[:, h1p + emb_e:]                                   # sum_f emb^2    (TB, E)

    # ---- FM second-order term, lane-dense (1, TB) ----
    ones_e = jnp.ones((1, emb_e), jnp.float32)
    fm = 0.5 * _rowdot(ones_e, s * s - ssq)

    # ---- Layer 1 (+ folded FX column); numeric part + bias; ReLU ----
    # TODO(synk): nn.Dropout(0.1) is treated as inference-mode identity (no in-kernel RNG mask).
    b1 = bias_ref[0:1, :h1p]
    h1 = jnp.maximum(
        h1_emb
        + jnp.dot(x2, w1n_ref[...], preferred_element_type=jnp.float32)
        + b1, 0.0)                                               # (TB, H1P); col H1 == zfx

    # ---- Layer 2 (+ zfx passthrough column + constant-1 column carrying b3 later) ----
    b2 = bias_ref[1:2, :h2p]
    h2 = jnp.maximum(
        jnp.dot(h1.astype(jnp.bfloat16), w2_ref[...],
                preferred_element_type=jnp.float32) + b2, 0.0)   # (TB, H2P)

    # ---- Tail: single M=8 rowdot -> row 0 = w3.h2 + b3 (pre-ReLU), row 1 = zfx ----
    zm = _rowdot(w3c_ref[...], h2.astype(jnp.bfloat16))          # (8, TB)
    z = jnp.maximum(zm[0:1, :], 0.0) + zm[1:2, :] + fm           # (1, TB)

    out_ref[...] = jax.nn.sigmoid(z)                             # lane-dense unmasked store


# ------------------------- one-time parameter fusion (hoisted out of the call path) ----------

def make_deepwide_kernel_params(params, num_fields):
    """Precompute the fused/packed resident tables once."""
    f32 = jnp.float32
    emb = params["emb_table"].astype(f32)            # (cat_dims, E)
    cat_dims, E = emb.shape
    F = num_fields
    FE = F * E
    w1, b1 = params["w1"], params["b1"]              # (FE+NUM, H1), (1, H1)
    w2, b2 = params["w2"], params["b2"]              # (H1, H2),    (1, H2)
    w3, b3 = params["w3"], params["b3"]              # (H2, 1),     (1, 1)
    wfx, bfx = params["wfx"], params["bfx"]          # (FE+NUM, 1), (1, 1)
    H1, H2 = w1.shape[1], w2.shape[1]
    NUM = w1.shape[0] - FE

    H1P = _round_up(H1 + 1, 8)       # +1: folded FX output column
    H2P = _round_up(H2 + 2, 8)       # +2: zfx passthrough column, constant-1 column (b3)
    FCP = _round_up(F * cat_dims, 128)
    BW = max(H1P, H2P)
    hi = jax.lax.Precision.HIGHEST

    # Layer-1 weights extended with the FX column, split emb/numeric.
    w1e_ext = (jnp.zeros((FE, H1P), f32).at[:, :H1].set(w1[:FE]).at[:, H1].set(wfx[:FE, 0]))
    w1n_ext = (jnp.zeros((NUM, H1P), f32).at[:, :H1].set(w1[FE:]).at[:, H1].set(wfx[FE:, 0]))
    b1_ext = jnp.zeros((1, H1P), f32).at[:, :H1].set(b1).at[0, H1].set(bfx[0, 0])

    # Embedding gather folded into layer 1: block-diagonal table pre-multiplied by w1e_ext,
    # concatenated with the tiled emb / emb^2 tables -> one resident matmul table.
    w_big = jnp.kron(jnp.eye(F, dtype=f32), emb)                              # (F*cat, FE)
    t_sum = jnp.tile(emb, (F, 1))                                             # (F*cat, E)
    t_sq = jnp.tile(emb * emb, (F, 1))                                        # (F*cat, E)
    fused = jnp.concatenate(
        [jnp.dot(w_big, w1e_ext, precision=hi), t_sum, t_sq], axis=1)         # (F*cat, H1P+2E)
    fused = jnp.zeros((FCP, H1P + 2 * E), f32).at[:F * cat_dims].set(fused)

    # Layer 2 extended: zfx passthrough (col H2) + constant-one column (col H2+1).
    w2_ext = jnp.zeros((H1P, H2P), f32).at[:H1, :H2].set(w2).at[H1, H2].set(1.0)
    b2_ext = jnp.zeros((1, H2P), f32).at[:, :H2].set(b2).at[0, H2 + 1].set(1.0)

    # Tail rowdot weights: row 0 = [w3 | 0 | b3], row 1 = zfx selector, rows 2..7 = 0.
    w3c = (jnp.zeros((8, H2P), f32)
           .at[0, :H2].set(w3[:, 0]).at[0, H2 + 1].set(b3[0, 0])
           .at[1, H2].set(1.0))

    bias_pack = jnp.concatenate(
        [jnp.zeros((1, BW), f32).at[:, :H1P].set(b1_ext),
         jnp.zeros((1, BW), f32).at[:, :H2P].set(b2_ext)], axis=0)            # (2, BW) f32

    bf16 = jnp.bfloat16
    return {
        "fused": fused.astype(bf16),       # (FCP, H1P+2E)
        "w1n": w1n_ext.astype(bf16),       # (NUM, H1P)
        "w2": w2_ext.astype(bf16),         # (H1P, H2P)
        "w3c": w3c.astype(bf16),           # (8, H2P)
        "bias": bias_pack,                 # (2, BW) f32
    }


# ------------------------- wrapper -------------------------

@functools.partial(jax.jit, static_argnames=("cat_dims", "block_b"))
def deepwide_forward(x1, x2, kp, *, cat_dims, block_b=4096):
    """x1: (B, F) int, x2: (B, NUM) f32. Returns (B,) f32 probabilities."""
    B, F = x1.shape
    NUM = x2.shape[1]
    FCP, NF = kp["fused"].shape
    H1P = kp["w1n"].shape[1]
    H2P = kp["w2"].shape[1]
    BW = kp["bias"].shape[1]

    # Batch tiling: big tiles amortize the ~0.35us/step overhead; when B > block_b the
    # grid is always >= 2 so "parallel" can shard batch tiles across v7x's two TCs.
    TB = block_b if B > block_b else _round_up(B, 8)
    Bp = _round_up(B, TB)
    x1p = x1.astype(jnp.int32)
    x2p = x2.astype(jnp.float32)
    if Bp != B:
        x1p = jnp.pad(x1p, ((0, Bp - B), (0, 0)))
        x2p = jnp.pad(x2p, ((0, Bp - B), (0, 0)))

    # Rough VMEM budget (~1.5 KiB/row of intermediates + resident weights); only raise the
    # scoped-VMEM limit if a very large TB sweep needs it (v5e default 16 MiB scoped).
    est_bytes = TB * 1536 + (1 << 20)
    vmem_limit = None if est_bytes <= (16 << 20) else min(2 * est_bytes, 60 << 20)

    def resident(shape):
        # Full-array block with a constant index_map -> stays VMEM-resident across the grid.
        return pl.BlockSpec(shape, lambda i: (0, 0))

    kernel = functools.partial(deepwide_kernel, cat_dims=cat_dims)

    out = pl.pallas_call(
        kernel,
        out_shape=jax.ShapeDtypeStruct((1, Bp), jnp.float32),
        grid=(Bp // TB,),
        in_specs=[
            pl.BlockSpec((TB, F), lambda i: (i, 0)),      # x1 batch tile
            pl.BlockSpec((TB, NUM), lambda i: (i, 0)),    # x2 batch tile
            resident((FCP, NF)),                          # fused emb/FM/layer-1 table (bf16)
            resident((NUM, H1P)),                         # layer-1 numeric weights (bf16)
            resident((H1P, H2P)),                         # layer-2 weights (bf16)
            resident((8, H2P)),                           # tail rowdot weights (bf16)
            resident((2, BW)),                            # packed biases (f32)
        ],
        out_specs=pl.BlockSpec((1, TB), lambda i: (0, i)),   # lane-dense output
        compiler_params=pltpu.CompilerParams(
            dimension_semantics=("parallel",),
            vmem_limit_bytes=vmem_limit),
    )(x1p, x2p, kp["fused"], kp["w1n"], kp["w2"], kp["w3c"], kp["bias"])

    return out[0, :B]


# ------------------------- pure-JAX reference (the spec) -------------------------

def deepwide_reference(x1, x2, params):
    emb_table = params["emb_table"]
    B, F = x1.shape
    cat, E = emb_table.shape
    emb = jnp.take(emb_table, x1.astype(jnp.int32).reshape(-1), axis=0).reshape(B, F, E)
    square_of_sum = jnp.sum(emb, axis=1) ** 2
    sum_of_square = jnp.sum(emb * emb, axis=1)
    cated = jnp.concatenate([emb.reshape(B, F * E), x2], axis=-1)
    z = jnp.maximum(cated @ params["wfx"] + params["bfx"], 0.0)          # FXlayer
    h = jnp.maximum(cated @ params["w1"] + params["b1"], 0.0)            # MLP layer 1
    h = jnp.maximum(h @ params["w2"] + params["b2"], 0.0)                # MLP layer 2
    h = jnp.maximum(h @ params["w3"] + params["b3"], 0.0)                # MLP layer 3 (out=1)
    z = z + h
    z = z + 0.5 * jnp.sum(square_of_sum - sum_of_square, axis=1, keepdims=True)
    return jax.nn.sigmoid(z).reshape(-1)


# ------------------------- main -------------------------

if __name__ == "__main__":
    # Hyperparameters (small, consistent with the module's __init__).
    cat_F_dims = [3, 5, 4, 6]          # F = 4 categorical fields
    emb_dim = 8
    MLP_dims = [32, 16, 1]             # last dim 1 so `z += self.MLP(...)` is well-formed
    numerical_dim = 4
    B = 8

    cat_dims = sum(cat_F_dims)         # 18
    F = len(cat_F_dims)
    D0 = F * emb_dim + numerical_dim   # 36 = input dim of MLP / FXlayer

    key = jax.random.PRNGKey(0)
    ks = jax.random.split(key, 12)

    params = {
        "emb_table": jax.random.normal(ks[0], (cat_dims, emb_dim), jnp.float32) * 0.1,
        # Linear weights stored (in, out); input order matches torch.cat((emb_flat, x2), -1).
        "w1":  jax.random.normal(ks[1], (D0, MLP_dims[0]), jnp.float32) * 0.1,
        "b1":  jax.random.normal(ks[2], (1, MLP_dims[0]), jnp.float32) * 0.1,
        "w2":  jax.random.normal(ks[3], (MLP_dims[0], MLP_dims[1]), jnp.float32) * 0.1,
        "b2":  jax.random.normal(ks[4], (1, MLP_dims[1]), jnp.float32) * 0.1,
        "w3":  jax.random.normal(ks[5], (MLP_dims[1], MLP_dims[2]), jnp.float32) * 0.1,
        "b3":  jax.random.normal(ks[6], (1, MLP_dims[2]), jnp.float32) * 0.1,
        "wfx": jax.random.normal(ks[7], (D0, 1), jnp.float32) * 0.1,
        "bfx": jax.random.normal(ks[8], (1, 1), jnp.float32) * 0.1,
    }

    x1 = jax.random.randint(ks[9], (B, F), 0, cat_dims, dtype=jnp.int32)
    x2 = jax.random.normal(ks[10], (B, numerical_dim), jnp.float32)

    # One-time fusion/packing of the resident tables (hoisted out of the per-call path).
    kp = jax.tree_util.tree_map(jax.block_until_ready,
                                make_deepwide_kernel_params(params, num_fields=F))

    out = jax.block_until_ready(
        deepwide_forward(x1, x2, kp, cat_dims=cat_dims, block_b=4096))
    ref = jax.block_until_ready(deepwide_reference(x1, x2, params))

    # Tolerance accommodates bf16 MXU operands vs. the f32 reference.
    np.testing.assert_allclose(np.asarray(out), np.asarray(ref), rtol=2e-3, atol=2e-3)

    print("KERNEL_OK")
</pallas_src>

<mosaic_0001>
module attributes {stable_mosaic.version = 11 : i64} {
  func.func @deepwide_kernel(%arg0: i32, %arg1: memref<8x4xi32, #tpu.memory_space<vmem>>, %arg2: memref<8x4xf32, #tpu.memory_space<vmem>>, %arg3: memref<128x56xbf16, #tpu.memory_space<vmem>>, %arg4: memref<4x40xbf16, #tpu.memory_space<vmem>>, %arg5: memref<40x24xbf16, #tpu.memory_space<vmem>>, %arg6: memref<8x24xbf16, #tpu.memory_space<vmem>>, %arg7: memref<2x40xf32, #tpu.memory_space<vmem>>, %arg8: memref<1x8xf32, #tpu.memory_space<vmem>>) attributes {dimension_semantics = [#tpu.dimension_semantics<parallel>], iteration_bounds = array<i64: 1>, scalar_prefetch = 0 : i64, scratch_operands = 0 : i64, tpu.core_type = #tpu.core_type<tc>, window_params = [{transform_indices = @transform_0, window_bounds = array<i64: 8, 4>}, {transform_indices = @transform_1, window_bounds = array<i64: 8, 4>}, {pipeline_mode = #tpu.pipeline_mode<synchronous>, transform_indices = @transform_2, window_bounds = array<i64: 128, 56>}, {pipeline_mode = #tpu.pipeline_mode<synchronous>, transform_indices = @transform_3, window_bounds = array<i64: 4, 40>}, {pipeline_mode = #tpu.pipeline_mode<synchronous>, transform_indices = @transform_4, window_bounds = array<i64: 40, 24>}, {pipeline_mode = #tpu.pipeline_mode<synchronous>, transform_indices = @transform_5, window_bounds = array<i64: 8, 24>}, {pipeline_mode = #tpu.pipeline_mode<synchronous>, transform_indices = @transform_6, window_bounds = array<i64: 2, 40>}, {transform_indices = @transform_7, window_bounds = array<i64: 1, 8>}]} {
    %c0 = arith.constant 0 : index
    %c0_0 = arith.constant 0 : index
    %0 = vector.load %arg1[%c0, %c0_0] : memref<8x4xi32, #tpu.memory_space<vmem>>, vector<8x4xi32>
    %c0_1 = arith.constant 0 : index
    %c0_2 = arith.constant 0 : index
    %1 = vector.load %arg2[%c0_1, %c0_2] : memref<8x4xf32, #tpu.memory_space<vmem>>, vector<8x4xf32>
    %2 = arith.truncf %1 : vector<8x4xf32> to vector<8x4xbf16>
    %3 = tpu.iota {dimensions = array<i32: 1>} : vector<8x128xi32>
    %4 = vector.extract_strided_slice %0 {offsets = [0, 0], sizes = [8, 1], strides = [1, 1]} : vector<8x4xi32> to vector<8x1xi32>
    %5 = vector.broadcast %4 : vector<8x1xi32> to vector<8x128xi32>
    %6 = arith.cmpi eq, %3, %5 : vector<8x128xi32>
    %7 = vector.extract_strided_slice %0 {offsets = [0, 1], sizes = [8, 1], strides = [1, 1]} : vector<8x4xi32> to vector<8x1xi32>
    %c18_i32 = arith.constant 18 : i32
    %8 = vector.broadcast %c18_i32 : i32 to vector<8x1xi32>
    %9 = arith.addi %7, %8 : vector<8x1xi32>
    %10 = vector.broadcast %9 : vector<8x1xi32> to vector<8x128xi32>
    %11 = arith.cmpi eq, %3, %10 : vector<8x128xi32>
    %12 = arith.ori %6, %11 : vector<8x128xi1>
    %13 = vector.extract_strided_slice %0 {offsets = [0, 2], sizes = [8, 1], strides = [1, 1]} : vector<8x4xi32> to vector<8x1xi32>
    %c36_i32 = arith.constant 36 : i32
    %14 = vector.broadcast %c36_i32 : i32 to vector<8x1xi32>
    %15 = arith.addi %13, %14 : vector<8x1xi32>
    %16 = vector.broadcast %15 : vector<8x1xi32> to vector<8x128xi32>
    %17 = arith.cmpi eq, %3, %16 : vector<8x128xi32>
    %18 = arith.ori %12, %17 : vector<8x128xi1>
    %19 = vector.extract_strided_slice %0 {offsets = [0, 3], sizes = [8, 1], strides = [1, 1]} : vector<8x4xi32> to vector<8x1xi32>
    %c54_i32 = arith.constant 54 : i32
    %20 = vector.broadcast %c54_i32 : i32 to vector<8x1xi32>
    %21 = arith.addi %19, %20 : vector<8x1xi32>
    %22 = vector.broadcast %21 : vector<8x1xi32> to vector<8x128xi32>
    %23 = arith.cmpi eq, %3, %22 : vector<8x128xi32>
    %24 = arith.ori %18, %23 : vector<8x128xi1>
    %cst = arith.constant 1.000000e+00 : f32
    %cst_3 = arith.constant 0.000000e+00 : f32
    %25 = vector.broadcast %cst : f32 to vector<8x128xf32>
    %26 = vector.broadcast %cst_3 : f32 to vector<8x128xf32>
    %27 = arith.select %24, %25, %26 : vector<8x128xi1>, vector<8x128xf32>
    %28 = arith.truncf %27 : vector<8x128xf32> to vector<8x128xbf16>
    %c0_4 = arith.constant 0 : index
    %c0_5 = arith.constant 0 : index
    %29 = vector.load %arg3[%c0_4, %c0_5] : memref<128x56xbf16, #tpu.memory_space<vmem>>, vector<128x56xbf16>
    %cst_6 = arith.constant dense<0.000000e+00> : vector<8x56xf32>
    %30 = tpu.matmul %28, %29, %cst_6 {dimension_numbers = #tpu.dot_dimension_numbers<[1], [0], [0], [1], [0, 0, 1, 1], [], []>} : vector<8x128xbf16>, vector<128x56xbf16>, vector<8x56xf32> -> vector<8x56xf32>
    %31 = vector.extract_strided_slice %30 {offsets = [0, 0], sizes = [8, 40], strides = [1, 1]} : vector<8x56xf32> to vector<8x40xf32>
    %32 = vector.extract_strided_slice %30 {offsets = [0, 40], sizes = [8, 8], strides = [1, 1]} : vector<8x56xf32> to vector<8x8xf32>
    %33 = vector.extract_strided_slice %30 {offsets = [0, 48], sizes = [8, 8], strides = [1, 1]} : vector<8x56xf32> to vector<8x8xf32>
    %cst_7 = arith.constant 1.000000e+00 : f32
    %34 = vector.broadcast %cst_7 : f32 to vector<1x8xf32>
    %35 = arith.mulf %32, %32 : vector<8x8xf32>
    %36 = arith.subf %35, %33 : vector<8x8xf32>
    %cst_8 = arith.constant dense<0.000000e+00> : vector<1x8xf32>
    %37 = tpu.matmul %34, %36, %cst_8 {dimension_numbers = #tpu.dot_dimension_numbers<[1], [1], [0], [0], [0, 0, 1, 0], [], []>} : vector<1x8xf32>, vector<8x8xf32>, vector<1x8xf32> -> vector<1x8xf32>
    %cst_9 = arith.constant 5.000000e-01 : f32
    %38 = vector.broadcast %cst_9 : f32 to vector<1x8xf32>
    %39 = arith.mulf %38, %37 : vector<1x8xf32>
    %c0_10 = arith.constant 0 : index
    %c0_11 = arith.constant 0 : index
    %40 = vector.load %arg7[%c0_10, %c0_11] : memref<2x40xf32, #tpu.memory_space<vmem>>, vector<1x40xf32>
    %c0_12 = arith.constant 0 : index
    %c0_13 = arith.constant 0 : index
    %41 = vector.load %arg4[%c0_12, %c0_13] : memref<4x40xbf16, #tpu.memory_space<vmem>>, vector<4x40xbf16>
    %cst_14 = arith.constant dense<0.000000e+00> : vector<8x40xf32>
    %42 = tpu.matmul %2, %41, %cst_14 {dimension_numbers = #tpu.dot_dimension_numbers<[1], [0], [0], [1], [0, 0, 1, 1], [], []>} : vector<8x4xbf16>, vector<4x40xbf16>, vector<8x40xf32> -> vector<8x40xf32>
    %43 = arith.addf %31, %42 : vector<8x40xf32>
    %44 = vector.broadcast %40 : vector<1x40xf32> to vector<8x40xf32>
    %45 = arith.addf %43, %44 : vector<8x40xf32>
    %cst_15 = arith.constant 0.000000e+00 : f32
    %46 = vector.broadcast %cst_15 : f32 to vector<8x40xf32>
    %47 = arith.maximumf %45, %46 : vector<8x40xf32>
    %c1 = arith.constant 1 : index
    %c0_16 = arith.constant 0 : index
    %48 = vector.load %arg7[%c1, %c0_16] : memref<2x40xf32, #tpu.memory_space<vmem>>, vector<1x24xf32>
    %49 = arith.truncf %47 : vector<8x40xf32> to vector<8x40xbf16>
    %c0_17 = arith.constant 0 : index
    %c0_18 = arith.constant 0 : index
    %50 = vector.load %arg5[%c0_17, %c0_18] : memref<40x24xbf16, #tpu.memory_space<vmem>>, vector<40x24xbf16>
    %cst_19 = arith.constant dense<0.000000e+00> : vector<8x24xf32>
    %51 = tpu.matmul %49, %50, %cst_19 {dimension_numbers = #tpu.dot_dimension_numbers<[1], [0], [0], [1], [0, 0, 1, 1], [], []>} : vector<8x40xbf16>, vector<40x24xbf16>, vector<8x24xf32> -> vector<8x24xf32>
    %52 = vector.broadcast %48 : vector<1x24xf32> to vector<8x24xf32>
    %53 = arith.addf %51, %52 : vector<8x24xf32>
    %cst_20 = arith.constant 0.000000e+00 : f32
    %54 = vector.broadcast %cst_20 : f32 to vector<8x24xf32>
    %55 = arith.maximumf %53, %54 : vector<8x24xf32>
    %c0_21 = arith.constant 0 : index
    %c0_22 = arith.constant 0 : index
    %56 = vector.load %arg6[%c0_21, %c0_22] : memref<8x24xbf16, #tpu.memory_space<vmem>>, vector<8x24xbf16>
    %57 = arith.truncf %55 : vector<8x24xf32> to vector<8x24xbf16>
    %cst_23 = arith.constant dense<0.000000e+00> : vector<8x8xf32>
    %58 = tpu.matmul %56, %57, %cst_23 {dimension_numbers = #tpu.dot_dimension_numbers<[1], [1], [0], [0], [0, 0, 1, 0], [], []>} : vector<8x24xbf16>, vector<8x24xbf16>, vector<8x8xf32> -> vector<8x8xf32>
    %59 = vector.extract_strided_slice %58 {offsets = [0, 0], sizes = [1, 8], strides = [1, 1]} : vector<8x8xf32> to vector<1x8xf32>
    %cst_24 = arith.constant 0.000000e+00 : f32
    %60 = vector.broadcast %cst_24 : f32 to vector<1x8xf32>
    %61 = arith.maximumf %59, %60 : vector<1x8xf32>
    %62 = vector.extract_strided_slice %58 {offsets = [1, 0], sizes = [1, 8], strides = [1, 1]} : vector<8x8xf32> to vector<1x8xf32>
    %63 = arith.addf %61, %62 : vector<1x8xf32>
    %64 = arith.addf %63, %39 : vector<1x8xf32>
    %65 = arith.negf %64 : vector<1x8xf32>
    %66 = math.exp %65 : vector<1x8xf32>
    %cst_25 = arith.constant 1.000000e+00 : f32
    %67 = vector.broadcast %cst_25 : f32 to vector<1x8xf32>
    %68 = arith.addf %67, %66 : vector<1x8xf32>
    %69 = arith.divf %67, %68 : vector<1x8xf32>
    %c0_26 = arith.constant 0 : index
    %c0_27 = arith.constant 0 : index
    %70 = vector.load %arg8[%c0_26, %c0_27] : memref<1x8xf32, #tpu.memory_space<vmem>>, vector<1x8xf32>
    tpu.vector_store %arg8[%c0_26, %c0_27], %69 {strides = array<i32>} : memref<1x8xf32, #tpu.memory_space<vmem>>, vector<1x8xf32>,
    return
  }
  func.func @transform_0(%arg0: i32) -> (i32, i32) {
    %c0_i32 = arith.constant 0 : i32
    %c0_i32_0 = arith.constant 0 : i32
    return %arg0, %c0_i32 : i32, i32
  }
  func.func @transform_1(%arg0: i32) -> (i32, i32) {
    %c0_i32 = arith.constant 0 : i32
    %c0_i32_0 = arith.constant 0 : i32
    return %arg0, %c0_i32 : i32, i32
  }
  func.func @transform_2(%arg0: i32) -> (i32, i32) {
    %c0_i32 = arith.constant 0 : i32
    %c0_i32_0 = arith.constant 0 : i32
    %c0_i32_1 = arith.constant 0 : i32
    return %c0_i32, %c0_i32_0 : i32, i32
  }
  func.func @transform_3(%arg0: i32) -> (i32, i32) {
    %c0_i32 = arith.constant 0 : i32
    %c0_i32_0 = arith.constant 0 : i32
    %c0_i32_1 = arith.constant 0 : i32
    return %c0_i32, %c0_i32_0 : i32, i32
  }
  func.func @transform_4(%arg0: i32) -> (i32, i32) {
    %c0_i32 = arith.constant 0 : i32
    %c0_i32_0 = arith.constant 0 : i32
    %c0_i32_1 = arith.constant 0 : i32
    return %c0_i32, %c0_i32_0 : i32, i32
  }
  func.func @transform_5(%arg0: i32) -> (i32, i32) {
    %c0_i32 = arith.constant 0 : i32
    %c0_i32_0 = arith.constant 0 : i32
    %c0_i32_1 = arith.constant 0 : i32
    return %c0_i32, %c0_i32_0 : i32, i32
  }
  func.func @transform_6(%arg0: i32) -> (i32, i32) {
    %c0_i32 = arith.constant 0 : i32
    %c0_i32_0 = arith.constant 0 : i32
    %c0_i32_1 = arith.constant 0 : i32
    return %c0_i32, %c0_i32_0 : i32, i32
  }
  func.func @transform_7(%arg0: i32) -> (i32, i32) {
    %c0_i32 = arith.constant 0 : i32
    %c0_i32_0 = arith.constant 0 : i32
    return %c0_i32, %arg0 : i32, i32
  }
}

</mosaic_0001>

<bundles_post_ra>
// kernel: deepwide_forward.1
= control target key start
LH: loop header
LB: loop body
LE: loop exit
PB: predicated region body
PF: predicated region fallthrough
CT: control target
= control target key end

     0   :  { %v411_v2 = vmov 0   ;;  %v412_v3 = vmov 2   ;;  %s514_s0 = inlined_call_operand.vmem [shape: s32[8,4], index: 0, kind: input, shape index: {}]   ;;  %s515_s1 = inlined_call_operand.vmem [shape: f32[8,4], index: 1, kind: input, shape index: {}]   ;;  %s516_s2 = inlined_call_operand.vmem [shape: bf16[128,56], index: 2, kind: input, shape index: {}]   ;;  %s517_s3 = inlined_call_operand.vmem [shape: bf16[4,40], index: 3, kind: input, shape index: {}]   ;;  %s518_s4 = inlined_call_operand.vmem [shape: bf16[40,24], index: 4, kind: input, shape index: {}]   ;;  %s519_s5 = inlined_call_operand.vmem [shape: bf16[8,24], index: 5, kind: input, shape index: {}]   ;;  %s520_s6 = inlined_call_operand.vmem [shape: f32[2,40], index: 6, kind: input, shape index: {}]   ;;  %s521_s7 = inlined_call_operand.hbm [shape: f32[1,8], index: 7, kind: output, shape index: {}]  }
   0x1   :  { %v28_v0 = vld [vmem:[%s514_s0] sm:$0xff]  ;;  %v362_v1 = vld [vmem:[%s516_s2 + $0x38] sm:$0xff]  ;;  %374 = vset.pattern.permute.xlu0 %v411_v2  ;;  %376 = vset.pattern.permute.xlu1 %v412_v3  ;;  %v361_v5 = vld [vmem:[%s516_s2 + $0x30] sm:$0xff] }
   0x2   :  { %v43_v4 = vadd.s32 36, %v28_v0  ;;  %34 = vperm.xlu0 %374, %v28_v0   ;;  %121 = vmatpush.bf16.msra.mxu0 %v362_v1 }
   0x4   :  { %45 = vperm.xlu1 %376, %v43_v4  }
   0x5   :  { %12 = vsyncpa [#allocation3], 0  ;;  %v360_v6 = vld [vmem:[%s516_s2 + $0x28] sm:$0xff]  ;;  %v37_v7 = vadd.s32 18, %v28_v0  ;;  %v49_v8 = vadd.s32 54, %v28_v0  ;;  %v413_v9 = vmov 1   ;;  %v31_v26 = vlaneseq }
   0x6   :  { %122 = vmatpush.bf16.msra.mxu0 %v361_v5  ;;  %v359_v10 = vld [vmem:[%s516_s2 + $0x20] sm:$0xff]  ;;  %v414_v11 = vmov 3   ;;  %v358_v12 = vld [vmem:[%s516_s2 + $0x18] sm:$0xff]  ;;  %v357_v13 = vld [vmem:[%s516_s2 + $0x10] sm:$0xff]  ;;  %vm176_vm0 = vcmask 1041408   ;;  %vm172_vm1 = vcmask 31744  }
   0x7   :  { %v171_v14 = vld [vmem:[%s517_s3] sm:$0x3]  ;;  %v356_v17 = vld [vmem:[%s516_s2 + $0x8] sm:$0xff]  ;;  %v203_v20 = vld [vmem:[%s518_s4 + $0x10] sm:$0xf]  ;;  %vm224_vm2 = vcmask 1043456  }
   0x8   :  { %v178_v15 = vsel %vm176_vm0, %v171_v14, 0  ;;  %v29_v16 = vld [vmem:[%s515_s1] sm:$0xff]  ;;  %v214_v21 = vunpack.c.l.b16 %v203_v20  ;;  %v32_v27 = vand.u32 127, %v31_v26  ;;  %v415_v30 = vmov 1.0|1.0   ;;  %v364_v32 = vld [vmem:[%s518_s4 + $0x8] sm:$0xff] }
   0x9   :  { %187 = vmatpush.bf16.msra.mxu2 %v178_v15  ;;  %v30_v18 = vpack.c.bf16 %v29_v16, %v29_v16  ;;  %v355_v19 = vld [vmem:[%s516_s2] sm:$0xff]  ;;  %s416_s27 = smov 120   ;;  %vm220_vm11 = vcmask 326656   ;;  %vm143_vm12 = vcmask 64512   ;;  %vm244_vm13 = vcmask 195584   ;;  %s298_s10 = sshll.u32 %s521_s7, 4  ;;  %s299_s10 = int_to_ptr.hbm [resolvable:$true] %s298_s10 }
   0xa   :  { %375 = vset.pattern.permute.xlu0 %v413_v9  ;;  %123 = vmatpush.bf16.msra.mxu0 %v360_v6  ;;  %v217_v22 = vpack.c.b16 %v214_v21, %v214_v21  ;;  %v363_v33 = vld [vmem:[%s518_s4] sm:$0xff]  ;;  %s417_s4 = smov 88   ;;  %v418_v53 = vmov 1.0  }
   0xb   :  { %39 = vperm.xlu0 %375, %v37_v7   ;;  %v379_v35 = vld [vmem:[%s520_s6] ss:$0 sm:$0xff]  ;;  %v380_v47 = vld [vmem:[%s520_s6 + $0x1] ss:$0 sm:$0xff] }
   0xc   :  { %377 = vset.pattern.permute.xlu1 %v414_v11  ;;  %343 = vmatmul.msk.bf16.vlgmr.msra.gmra.mxu2 %vm172_vm1, %v30_v18  ;;  %v226_v23 = vsel %vm224_vm2, %v217_v22, 0  ;;  %v242_v54 = vld [vmem:[%s519_s5] sm:$0xf]  ;;  %s419_s5 = smov [#allocation2]   ;;  %vm289_vm1 = vcmask 57344  }
   0xd   :  { %51 = vperm.xlu1 %377, %v49_v8   ;;  %233 = vmatpush.bf16.msra.mxu3 %v226_v23  ;;  %s296_s6 = sshll.u32 %s419_s5, 4  ;;  %s297_s6 = int_to_ptr.vmem [resolvable:$true] %s296_s6 }
   0xe   :  { %124 = vmatpush.bf16.msra.mxu0 %v359_v10 }
  0x11   :  { %234 = vmatpush.bf16.msra.mxu3 %v364_v32 }
  0x12   :  { %125 = vmatpush.bf16.msra.mxu0 %v358_v12 }
  0x13   :  { %378 = vset.pattern.permute.xlu0 %v414_v11 }
  0x15   :  { %235 = vmatpush.bf16.msra.mxu3 %v363_v33 }
  0x16   :  { %126 = vmatpush.bf16.msra.mxu0 %v357_v13 }
  0x1a   :  { %127 = vmatpush.bf16.msra.mxu0 %v356_v17 }
  0x1e   :  { %128 = vmatpush.bf16.msra.mxu0 %v355_v19 }
  0x74   :  { %v35_v24 = vpop.permute.xlu0 %34 }
  0x75   :  { %vm36_vm3 = vcmp.eq.s32.totalorder %v32_v27, %v35_v24 }
  0x76   :  { %v46_v25 = vpop.permute.xlu1 %45 }
  0x77   :  { %vm47_vm5 = vcmp.eq.s32.totalorder %v32_v27, %v46_v25 }
  0x7d   :  { %v40_v28 = vpop.permute.xlu0 %39 }
  0x7e   :  { %vm41_vm4 = vcmp.eq.s32.totalorder %v32_v27, %v40_v28 }
  0x7f   :  { %v52_v29 = vpop.permute.xlu1 %51  ;;  %vm42_vm6 = vmor %vm36_vm3, %vm41_vm4 }
  0x80   :  { %vm53_vm7 = vcmp.eq.s32.totalorder %v32_v27, %v52_v29  ;;  %vm48_vm8 = vmor %vm42_vm6, %vm47_vm5 }
  0x81   :  { %vm54_vm9 = vmor %vm48_vm8, %vm53_vm7 }
  0x82   :  { %vm339_vm10 = vmpackc.low %vm54_vm9, %vm54_vm9 }
  0x83   :  { %340 = vmatmul.msk.bf16.vlgmr.msra.gmra.mxu0 %vm339_vm10, %v415_v30 }
  0x8f   :  { %v189_v31 = vpop.f32.mrf.mxu2 }
  0x97   :  { %v191_v34 = vpop.f32.mrf.mxu2 }
 0x100   :  { %v130_v36 = vpop.f32.mrf.mxu0 }
 0x101   :  { %v193_v37 = vadd.f32 %v189_v31, %v130_v36  ;;  %136 = vrot.lane.b32.xlu2 %v130_v36, %s416_s27  ;;  %v134_v42 = vmul.f32 %v130_v36, %v130_v36 }
 0x103   :  { %v195_v38 = vadd.f32 %v379_v35, %v193_v37 }
 0x105   :  { %v196_v39 = vmax.f32 %v195_v38, 0.0 }
 0x107   :  { %v198_v40 = vpack.c.bf16 %v196_v39, %v196_v39 }
 0x108   :  { %v132_v41 = vpop.f32.mrf.mxu0 }
 0x109   :  { %352 = vmatmul.msk.bf16.vlgmr.msra.gmra.mxu3 %vm220_vm11, %v198_v40 }
 0x15b   :  { %v137_v43 = vpop.permute.xlu2 %136 }
 0x15c   :  { %v139_v44 = vsub.f32 %v134_v42, %v137_v43 }
 0x15e   :  { %141 = vrot.lane.b32.xlu2 %v139_v44, %s417_s4 }
 0x18c   :  { %v237_v45 = vpop.f32.mrf.mxu3 }
 0x18d   :  { %v238_v48 = vadd.f32 %v380_v47, %v237_v45 }
 0x18f   :  { %v241_v49 = vmax.f32 %v238_v48, 0.0 }
 0x191   :  { %v243_v50 = vpack.c.bf16 %v241_v49, %v241_v49 }
 0x193   :  { %v249_v52 = vsel %vm244_vm13, %v243_v50, 0 }
 0x194   :  { %v239_v46 = vpop.f32.mrf.mxu3 }
 0x1b8   :  { %v142_v51 = vpop.permute.xlu2 %141 }
 0x1b9   :  { %341 = vmatpush.xpose.msk.msra.mxu1 %vm143_vm12, %v142_v51 }
 0x1bc   :  { %342 = vmatmul.msk.f32.vlgmr.msra.gmra.mxu1 %vm143_vm12, %v418_v53 }
 0x1bd   :  { %258 = vmatpush.bf16.xpose.msrb.mxu1 %v249_v52 }
 0x1c4   :  { %353 = vmatmul.msk.bf16.vlgmr.msrb.gmra.mxu1 %vm244_vm13, %v242_v54 }
 0x239   :  { %v166_v55 = vpop.f32.mrf.mxu1 }
 0x23a   :  { %v169_v59 = vmul.f32 0.5, %v166_v55 }
 0x241   :  { %v260_v56 = vpop.f32.mrf.mxu1 }
 0x242   :  { %v264_v57 = vmax.f32 %v260_v56, 0.0  ;;  %v266_v58 = vrot.slane %v260_v56, 1 }
 0x244   :  { %v268_v60 = vadd.f32 %v266_v58, %v264_v57 }
 0x246   :  { %v269_v61 = vadd.f32 %v268_v60, %v169_v59 }
 0x248   :  { %v354_v62 = vmul.f32 -1.442695, %v269_v61 }
 0x249   :  { %v262_v63 = vpop.f32.mrf.mxu1 }
 0x24a   :  { %381 = vpow2.f32 %v354_v62 }
 0x250   :  { %v382_v0 = vpop.eup %381 }
 0x251   :  { %v273_v1 = vadd.f32 1.0, %v382_v0 }
 0x253   :  { %383 = vrcp.f32 %v273_v1  ;;  %v285_v5 = vand.u32 2147483648, %v273_v1  ;;  %v283_v7 = vand.u32 2147483647, %v273_v1  ;;  %vm279_vm15 = vweird.f32 %v273_v1 }
 0x255   :  { %v286_v9 = vor.u32 1.1754944e-38, %v285_v5  ;;  %vm284_vm2 = vcmp.eq.f32.partialorder %v283_v7, 8.507059e+37 }
 0x259   :  { %v384_v2 = vpop.eup %383 }
 0x25a   :  { %v275_v3 = vmul.f32 %v384_v2, %v273_v1  ;;  %vm280_vm14 = vweird.f32 %v384_v2 }
 0x25b   :  { %vm281_vm0 = vmor %vm279_vm15, %vm280_vm14 }
 0x25c   :  { %v276_v4 = vsub.f32 1.0, %v275_v3 }
 0x25e   :  { %v277_v6 = vmul.f32 %v384_v2, %v276_v4 }
 0x260   :  { %v278_v8 = vadd.f32 %v384_v2, %v277_v6 }
 0x262   :  { %v282_v10 = vsel %vm281_vm0, %v384_v2, %v278_v8 }
 0x263   :  { %v287_v11 = vsel %vm284_vm2, %v286_v9, %v282_v10 }
 0x264   :  { %290 = vst.msk [vmem:[#allocation2] sm:$0x1] %vm289_vm1, %v287_v11 }
 0x265   :  { %301 = dma.vmem_to_hbm [thread:$0]  %s297_s6, 16, %s299_s10, [#allocation3]  }
 0x266   :  { %409 = dma.done.wait [#allocation3], 16  }
 0x267   :  { %410 = vsyncadd [#allocation3], 4294967280 }
 0x268   :  { %306 = vsyncpa [#allocation3], 1 }

</bundles_post_ra>
